<compile_context>
chip_gen: v6e
topology: v6e:2x2x1
jax: 0.10.0
libtpu: 0.0.40
codegen_flags: <defaults>
</compile_context>

<pallas_src>
import jax
import jax.numpy as jnp
from jax import lax
from jax.experimental import pallas as pl
from jax.experimental.pallas import tpu as pltpu


def _lora_kernel(x_ref, w_ref, a_ref, b_ref, bias_ref, o_ref, acc_ref, xa_ref):
    """One (tm, tn) output tile, accumulated over the K (= in_dim) grid axis.

    x_ref   : (tm, tk)        activations tile
    w_ref   : (tn, tk)        frozen linear weight tile, native (out, in) layout
    a_ref   : (tk, rank)      LoRA A tile
    b_ref   : (rank, tn)      LoRA B tile
    bias_ref: (1, tn)         bias tile
    o_ref   : (tm, tn)        output tile
    acc_ref : (tm, tn)  f32   scratch accumulator for x @ W.T
    xa_ref  : (tm, rank) f32  scratch accumulator for x @ A
    """
    k = pl.program_id(2)

    @pl.when(k == 0)
    def _():
        acc_ref[...] = jnp.zeros_like(acc_ref)
        xa_ref[...] = jnp.zeros_like(xa_ref)

    x = x_ref[...]

    # Base path: contract x (tm, tk) with W (tn, tk) on the shared K axis
    # (trans-B matmul on the MXU) -> no weight transpose needed anywhere.
    acc_ref[...] += lax.dot_general(
        x, w_ref[...],
        dimension_numbers=(((1,), (1,)), ((), ())),
        preferred_element_type=jnp.float32)

    # LoRA down-projection, accumulated over K. rank is tiny; this rides along
    # with the main weight stream. (Recomputed per j-tile so both M and N grid
    # axes stay safely "parallel" for megacore sharding.)
    xa_ref[...] += jnp.dot(x, a_ref[...], preferred_element_type=jnp.float32)

    # Finalize once per (i, j) tile: LoRA up-projection, bias, cast, store.
    @pl.when(k == pl.num_programs(2) - 1)
    def _():
        lora = jnp.dot(xa_ref[...], b_ref[...].astype(jnp.float32),
                       preferred_element_type=jnp.float32)
        out = acc_ref[...] + lora + bias_ref[...].astype(jnp.float32)
        o_ref[...] = out.astype(o_ref.dtype)


def _round_up(x, m):
    return (x + m - 1) // m * m


def _pick_tile(dim, target):
    """Largest multiple of 128 <= target that divides dim, else the full dim."""
    if dim % 128 == 0:
        t = min(target, dim)
        t -= t % 128
        while t >= 128:
            if dim % t == 0:
                return t
            t -= 128
    return dim


def lora_forward(x, weight, bias, A, B, *,
                 tm_target=256, tn_target=256, tk_target=512):
    """LoRA forward: linear(x) + (x @ A) @ B.

    x      : (..., in_dim)       arbitrary leading dims
    weight : (out_dim, in_dim)   frozen nn.Linear weight, native layout
    bias   : (out_dim,)
    A      : (in_dim, rank)
    B      : (rank, out_dim)
    """
    *lead, in_dim = x.shape
    out_dim = weight.shape[0]
    rank = A.shape[1]

    M = 1
    for d in lead:
        M *= d
    x2d = x.reshape(M, in_dim)

    tk = _pick_tile(in_dim, tk_target)
    tn = _pick_tile(out_dim, tn_target)
    tm = min(tm_target, _round_up(M, 8))
    m_pad = _round_up(M, tm)
    if m_pad != M:
        x2d = jnp.pad(x2d, ((0, m_pad - M), (0, 0)))

    bias2d = bias.reshape(1, out_dim)
    grid = (m_pad // tm, out_dim // tn, in_dim // tk)

    grid_spec = pltpu.PrefetchScalarGridSpec(
        num_scalar_prefetch=0,
        grid=grid,
        in_specs=[
            pl.BlockSpec((tm, tk), lambda i, j, k: (i, k)),      # x
            pl.BlockSpec((tn, tk), lambda i, j, k: (j, k)),      # W (out, in)
            pl.BlockSpec((tk, rank), lambda i, j, k: (k, 0)),    # A
            pl.BlockSpec((rank, tn), lambda i, j, k: (0, j)),    # B
            pl.BlockSpec((1, tn), lambda i, j, k: (0, j)),       # bias
        ],
        out_specs=pl.BlockSpec((tm, tn), lambda i, j, k: (i, j)),
        scratch_shapes=[
            pltpu.VMEM((tm, tn), jnp.float32),    # base accumulator
            pltpu.VMEM((tm, rank), jnp.float32),  # x @ A accumulator
        ],
    )

    out2d = pl.pallas_call(
        _lora_kernel,
        out_shape=jax.ShapeDtypeStruct((m_pad, out_dim), x.dtype),
        grid_spec=grid_spec,
        compiler_params=pltpu.CompilerParams(
            dimension_semantics=("parallel", "parallel", "arbitrary"),
            vmem_limit_bytes=48 * 1024 * 1024,
        ),
    )(x2d, weight, A, B, bias2d)

    if m_pad != M:
        out2d = out2d[:M]
    return out2d.reshape(*lead, out_dim)


if __name__ == "__main__":
    def reference(x, weight, bias, A, B):
        return x @ weight.T + bias + (x @ A) @ B

    key = jax.random.PRNGKey(0)

    # --- Test 1: toy shapes matching the PyTorch module (single-block grid) ---
    batch, seq, in_dim, out_dim, rank = 2, 8, 32, 32, 4
    k1, k2, k3, k4, k5, key = jax.random.split(key, 6)
    x = jax.random.normal(k1, (batch, seq, in_dim), dtype=jnp.float32)
    weight = jax.random.normal(k2, (out_dim, in_dim), dtype=jnp.float32) * 0.1
    bias = jax.random.normal(k3, (out_dim,), dtype=jnp.float32) * 0.1
    A = jax.random.normal(k4, (in_dim, rank), dtype=jnp.float32)
    B = jax.random.normal(k5, (rank, out_dim), dtype=jnp.float32)

    out = jax.block_until_ready(lora_forward(x, weight, bias, A, B))
    ref = reference(x, weight, bias, A, B)
    assert out.shape == (batch, seq, out_dim)
    assert jnp.allclose(out, ref, atol=1e-4, rtol=1e-4), "mismatch (toy shapes)"

    # --- Test 2: shape that exercises the full (i, j, k) tiling / K-reduction ---
    batch, seq, in_dim, out_dim, rank = 2, 256, 1024, 512, 4
    k1, k2, k3, k4, k5, key = jax.random.split(key, 6)
    x = jax.random.normal(k1, (batch, seq, in_dim), dtype=jnp.float32) * 0.05
    weight = jax.random.normal(k2, (out_dim, in_dim), dtype=jnp.float32) * 0.05
    bias = jax.random.normal(k3, (out_dim,), dtype=jnp.float32) * 0.1
    A = jax.random.normal(k4, (in_dim, rank), dtype=jnp.float32) * 0.05
    B = jax.random.normal(k5, (rank, out_dim), dtype=jnp.float32) * 0.05

    out = jax.block_until_ready(lora_forward(x, weight, bias, A, B))
    ref = reference(x, weight, bias, A, B)
    assert out.shape == (batch, seq, out_dim)
    assert jnp.allclose(out, ref, atol=2e-3, rtol=2e-3), "mismatch (tiled shapes)"

    print("KERNEL_OK")
</pallas_src>

<mosaic_0001>
module attributes {stable_mosaic.version = 11 : i64} {
  func.func @_lora_kernel(%arg0: i32, %arg1: i32, %arg2: i32, %arg3: memref<16x32xf32, #tpu.memory_space<vmem>>, %arg4: memref<32x32xf32, #tpu.memory_space<vmem>>, %arg5: memref<32x4xf32, #tpu.memory_space<vmem>>, %arg6: memref<4x32xf32, #tpu.memory_space<vmem>>, %arg7: memref<1x32xf32, #tpu.memory_space<vmem>>, %arg8: memref<16x32xf32, #tpu.memory_space<vmem>>, %arg9: memref<16x32xf32, #tpu.memory_space<vmem>>, %arg10: memref<16x4xf32, #tpu.memory_space<vmem>>) attributes {dimension_semantics = [#tpu.dimension_semantics<parallel>, #tpu.dimension_semantics<parallel>, #tpu.dimension_semantics<arbitrary>], iteration_bounds = array<i64: 1, 1, 1>, scalar_prefetch = 0 : i64, scratch_operands = 2 : i64, tpu.core_type = #tpu.core_type<tc>, window_params = [{transform_indices = @transform_0, window_bounds = array<i64: 16, 32>}, {transform_indices = @transform_1, window_bounds = array<i64: 32, 32>}, {transform_indices = @transform_2, window_bounds = array<i64: 32, 4>}, {transform_indices = @transform_3, window_bounds = array<i64: 4, 32>}, {transform_indices = @transform_4, window_bounds = array<i64: 1, 32>}, {transform_indices = @transform_5, window_bounds = array<i64: 16, 32>}]} {
    %c0_i32 = arith.constant 0 : i32
    %0 = arith.cmpi eq, %arg2, %c0_i32 : i32
    %1 = arith.extui %0 : i1 to i32
    %c0_i32_0 = arith.constant 0 : i32
    %2 = arith.cmpi ne, %1, %c0_i32_0 : i32
    scf.if %2 {
      %cst_17 = arith.constant 0.000000e+00 : f32
      %17 = vector.broadcast %cst_17 : f32 to vector<16x32xf32>
      %c0_18 = arith.constant 0 : index
      %c0_19 = arith.constant 0 : index
      %18 = vector.load %arg9[%c0_18, %c0_19] : memref<16x32xf32, #tpu.memory_space<vmem>>, vector<16x32xf32>
      tpu.vector_store %arg9[%c0_18, %c0_19], %17 {strides = array<i32>} : memref<16x32xf32, #tpu.memory_space<vmem>>, vector<16x32xf32>,
      %cst_20 = arith.constant 0.000000e+00 : f32
      %19 = vector.broadcast %cst_20 : f32 to vector<16x4xf32>
      %c0_21 = arith.constant 0 : index
      %c0_22 = arith.constant 0 : index
      %20 = vector.load %arg10[%c0_21, %c0_22] : memref<16x4xf32, #tpu.memory_space<vmem>>, vector<16x4xf32>
      tpu.vector_store %arg10[%c0_21, %c0_22], %19 {strides = array<i32>} : memref<16x4xf32, #tpu.memory_space<vmem>>, vector<16x4xf32>,
    } else {
    }
    %c0 = arith.constant 0 : index
    %c0_1 = arith.constant 0 : index
    %3 = vector.load %arg3[%c0, %c0_1] : memref<16x32xf32, #tpu.memory_space<vmem>>, vector<16x32xf32>
    %c0_2 = arith.constant 0 : index
    %c0_3 = arith.constant 0 : index
    %4 = vector.load %arg9[%c0_2, %c0_3] : memref<16x32xf32, #tpu.memory_space<vmem>>, vector<16x32xf32>
    %c0_4 = arith.constant 0 : index
    %c0_5 = arith.constant 0 : index
    %5 = vector.load %arg4[%c0_4, %c0_5] : memref<32x32xf32, #tpu.memory_space<vmem>>, vector<32x32xf32>
    %cst = arith.constant dense<0.000000e+00> : vector<16x32xf32>
    %6 = tpu.matmul %3, %5, %cst {dimension_numbers = #tpu.dot_dimension_numbers<[1], [1], [0], [0], [0, 0, 1, 0], [], []>} : vector<16x32xf32>, vector<32x32xf32>, vector<16x32xf32> -> vector<16x32xf32>
    %7 = arith.addf %4, %6 : vector<16x32xf32>
    %c0_6 = arith.constant 0 : index
    %c0_7 = arith.constant 0 : index
    %8 = vector.load %arg9[%c0_6, %c0_7] : memref<16x32xf32, #tpu.memory_space<vmem>>, vector<16x32xf32>
    tpu.vector_store %arg9[%c0_6, %c0_7], %7 {strides = array<i32>} : memref<16x32xf32, #tpu.memory_space<vmem>>, vector<16x32xf32>,
    %c0_8 = arith.constant 0 : index
    %c0_9 = arith.constant 0 : index
    %9 = vector.load %arg10[%c0_8, %c0_9] : memref<16x4xf32, #tpu.memory_space<vmem>>, vector<16x4xf32>
    %c0_10 = arith.constant 0 : index
    %c0_11 = arith.constant 0 : index
    %10 = vector.load %arg5[%c0_10, %c0_11] : memref<32x4xf32, #tpu.memory_space<vmem>>, vector<32x4xf32>
    %cst_12 = arith.constant dense<0.000000e+00> : vector<16x4xf32>
    %11 = tpu.matmul %3, %10, %cst_12 {dimension_numbers = #tpu.dot_dimension_numbers<[1], [0], [0], [1], [0, 0, 1, 1], [], []>} : vector<16x32xf32>, vector<32x4xf32>, vector<16x4xf32> -> vector<16x4xf32>
    %12 = arith.addf %9, %11 : vector<16x4xf32>
    %c0_13 = arith.constant 0 : index
    %c0_14 = arith.constant 0 : index
    %13 = vector.load %arg10[%c0_13, %c0_14] : memref<16x4xf32, #tpu.memory_space<vmem>>, vector<16x4xf32>
    tpu.vector_store %arg10[%c0_13, %c0_14], %12 {strides = array<i32>} : memref<16x4xf32, #tpu.memory_space<vmem>>, vector<16x4xf32>,
    %c0_i32_15 = arith.constant 0 : i32
    %14 = arith.cmpi eq, %arg2, %c0_i32_15 : i32
    %15 = arith.extui %14 : i1 to i32
    %c0_i32_16 = arith.constant 0 : i32
    %16 = arith.cmpi ne, %15, %c0_i32_16 : i32
    scf.if %16 {
      %c0_17 = arith.constant 0 : index
      %c0_18 = arith.constant 0 : index
      %17 = vector.load %arg10[%c0_17, %c0_18] : memref<16x4xf32, #tpu.memory_space<vmem>>, vector<16x4xf32>
      %c0_19 = arith.constant 0 : index
      %c0_20 = arith.constant 0 : index
      %18 = vector.load %arg6[%c0_19, %c0_20] : memref<4x32xf32, #tpu.memory_space<vmem>>, vector<4x32xf32>
      %cst_21 = arith.constant dense<0.000000e+00> : vector<16x32xf32>
      %19 = tpu.matmul %17, %18, %cst_21 {dimension_numbers = #tpu.dot_dimension_numbers<[1], [0], [0], [1], [0, 0, 1, 1], [], []>} : vector<16x4xf32>, vector<4x32xf32>, vector<16x32xf32> -> vector<16x32xf32>
      %c0_22 = arith.constant 0 : index
      %c0_23 = arith.constant 0 : index
      %20 = vector.load %arg9[%c0_22, %c0_23] : memref<16x32xf32, #tpu.memory_space<vmem>>, vector<16x32xf32>
      %21 = arith.addf %20, %19 : vector<16x32xf32>
      %c0_24 = arith.constant 0 : index
      %c0_25 = arith.constant 0 : index
      %22 = vector.load %arg7[%c0_24, %c0_25] : memref<1x32xf32, #tpu.memory_space<vmem>>, vector<1x32xf32>
      %23 = vector.broadcast %22 : vector<1x32xf32> to vector<16x32xf32>
      %24 = arith.addf %21, %23 : vector<16x32xf32>
      %c0_26 = arith.constant 0 : index
      %c0_27 = arith.constant 0 : index
      %25 = vector.load %arg8[%c0_26, %c0_27] : memref<16x32xf32, #tpu.memory_space<vmem>>, vector<16x32xf32>
      tpu.vector_store %arg8[%c0_26, %c0_27], %24 {strides = array<i32>} : memref<16x32xf32, #tpu.memory_space<vmem>>, vector<16x32xf32>,
    } else {
    }
    return
  }
  func.func @transform_0(%arg0: i32, %arg1: i32, %arg2: i32) -> (i32, i32) {
    %c0_i32 = arith.constant 0 : i32
    return %arg0, %arg2 : i32, i32
  }
  func.func @transform_1(%arg0: i32, %arg1: i32, %arg2: i32) -> (i32, i32) {
    %c0_i32 = arith.constant 0 : i32
    return %arg1, %arg2 : i32, i32
  }
  func.func @transform_2(%arg0: i32, %arg1: i32, %arg2: i32) -> (i32, i32) {
    %c0_i32 = arith.constant 0 : i32
    %c0_i32_0 = arith.constant 0 : i32
    return %arg2, %c0_i32 : i32, i32
  }
  func.func @transform_3(%arg0: i32, %arg1: i32, %arg2: i32) -> (i32, i32) {
    %c0_i32 = arith.constant 0 : i32
    %c0_i32_0 = arith.constant 0 : i32
    return %c0_i32, %arg1 : i32, i32
  }
  func.func @transform_4(%arg0: i32, %arg1: i32, %arg2: i32) -> (i32, i32) {
    %c0_i32 = arith.constant 0 : i32
    %c0_i32_0 = arith.constant 0 : i32
    return %c0_i32, %arg1 : i32, i32
  }
  func.func @transform_5(%arg0: i32, %arg1: i32, %arg2: i32) -> (i32, i32) {
    %c0_i32 = arith.constant 0 : i32
    return %arg0, %arg1 : i32, i32
  }
}

</mosaic_0001>

<bundles_post_ra>
// kernel: tpu_custom_call.1
= control target key start
LH: loop header
LB: loop body
LE: loop exit
PB: predicated region body
PF: predicated region fallthrough
CT: control target
= control target key end

     0   :  { %10 = vsyncpa [#allocation5], 0  ;;  %s564_s0 = inlined_call_operand.hbm [shape: f32[16,32], index: 0, kind: input, shape index: {}]   ;;  %s565_s1 = inlined_call_operand.vmem [shape: f32[32,32], index: 1, kind: input, shape index: {}]   ;;  %s566_s2 = inlined_call_operand.vmem [shape: f32[32,4], index: 2, kind: input, shape index: {}]   ;;  %s567_s3 = inlined_call_operand.vmem [shape: f32[4,32], index: 3, kind: input, shape index: {}]   ;;  %s568_s4 = inlined_call_operand.vmem [shape: f32[1,32], index: 4, kind: input, shape index: {}]   ;;  %s569_s5 = inlined_call_operand.hbm [shape: f32[16,32], index: 5, kind: output, shape index: {}]  }
   0x1   :  { %11 = vsyncpa [#allocation6], 0  ;;  %s463_s18 = smov [#allocation4]  }
   0x2   :  { %s17_s19 = sshll.u32 %s463_s18, 4  ;;  %s18_s19 = int_to_ptr.vmem [resolvable:$true] %s17_s19 }
   0x3   :  { %s427_s20 = scalar_lea.vmem %s18_s19, 256  ;;  %p432_p1 = scmp.lt.s32.totalorder %s18_s19, %s18_s19 }
   0x4   :  { %p428_p0 = scmp.ne.s32.totalorder %s18_s19, %s427_s20  ;;  %p433_p2 = scmp.lt.s32.totalorder %s427_s20, %s427_s20 }
   0x6   :  { %p434_p3 = por %p433_p2, %p432_p1 }
   0x8   :  { %p435_p4 = pnand %p434_p3, %p428_p0 }
   0xa   :  { %438 = shalt.err (!%p435_p4)
}
   0xb   :  { %s464_s21 = smov 128   ;;  %s465_s22 = smov 8  }
   0xc   :  { %23 = dma.hbm_to_vmem [thread:$0]  %s564_s0, 256, %s18_s19, [#allocation5], %s464_s21, %s464_s21, %s465_s22  }
   0xd   :  { %459 = dma.done.wait [#allocation5], 256  }
   0xe   :  { %460 = vsyncadd [#allocation5], 4294967040  ;;  %vm39_vm0 = vcmask 261120   ;;  %vm42_vm1 = vcmask 31744   ;;  %v466_v0 = vmov 0.0   ;;  %v156_v1 = vld [vmem:[%s566_s2 + $0x18] sm:$0xff] }
   0xf   :  { %44 = vst.msk [vmem:[#allocation3 + $0x8] sm:$0xff] %vm42_vm1, %v466_v0  ;;  %43 = vst.msk [vmem:[#allocation3] sm:$0xff] %vm42_vm1, %v466_v0  ;;  %v155_v2 = vld [vmem:[%s566_s2 + $0x10] sm:$0xff]  ;;  %398 = vmatprep.subr.mxu1 %v156_v1  ;;  %v45_v3 = vld [vmem:[#allocation4] sm:$0xff]  ;;  %vm249_vm2 = vcmask 1043456   ;;  %s467_s16 = smov [#allocation7]  }
  0x10   :  { %40 = vst.msk [vmem:[#allocation2] sm:$0xff] %vm39_vm0, %v466_v0  ;;  %41 = vst.msk [vmem:[#allocation2 + $0x8] sm:$0xff] %vm39_vm0, %v466_v0  ;;  %399 = vmatpush3.msra.mxu1 %v156_v1  ;;  %v154_v4 = vld [vmem:[%s566_s2 + $0x8] sm:$0xff]  ;;  %406 = vmatprep.mubr.msk.f32.mxu1 %vm39_vm0, %v45_v3  ;;  %v52_v5 = vld [vmem:[%s565_s1 + $0x18] sm:$0xff]  ;;  %s348_s17 = sshll.u32 %s467_s16, 4  ;;  %s349_s17 = int_to_ptr.vmem [resolvable:$true] %s348_s17 }
  0x11   :  { %v51_v6 = vld [vmem:[%s565_s1 + $0x10] sm:$0xff]  ;;  %400 = vmatprep.subr.mxu1 %v155_v2  ;;  %387 = vmatprep.subr.msk.mxu0 %vm39_vm0, %v52_v5  ;;  %v153_v7 = vld [vmem:[%s566_s2] sm:$0xff]  ;;  %v46_v8 = vld [vmem:[#allocation4 + $0x8] sm:$0xff]  ;;  %s439_s18 = scalar_lea.vmem %s349_s17, 256  ;;  %p444_p6 = scmp.lt.s32.totalorder %s349_s17, %s349_s17 }
  0x12   :  { %401 = vmatpush3.msra.mxu1 %v155_v2  ;;  %388 = vmatpush3.xpose.msk.msra.mxu0 %vm39_vm0, %v52_v5  ;;  %v50_v9 = vld [vmem:[%s565_s1 + $0x8] sm:$0xff]  ;;  %v49_v10 = vld [vmem:[%s565_s1] sm:$0xff]  ;;  %p440_p5 = scmp.ne.s32.totalorder %s349_s17, %s439_s18  ;;  %p445_p7 = scmp.lt.s32.totalorder %s439_s18, %s439_s18 }
  0x13   :  { %402 = vmatprep.subr.mxu1 %v154_v4  ;;  %389 = vmatprep.subr.msk.mxu0 %vm39_vm0, %v51_v6  ;;  %v242_v11 = vld [vmem:[%s567_s3] sm:$0xf] }
  0x14   :  { %403 = vmatpush3.msra.mxu1 %v154_v4  ;;  %395 = vmatprep.mubr.msk.f32.mxu0 %vm39_vm0, %v45_v3  ;;  %v371_v28 = vld [vmem:[%s568_s4] ss:$0 sm:$0xff]  ;;  %p446_p8 = por %p445_p7, %p444_p6 }
  0x15   :  { %404 = vmatprep.subr.mxu1 %v153_v7 }
  0x16   :  { %405 = vmatpush3.msra.mxu1 %v153_v7  ;;  %390 = vmatpush3.xpose.msk.msra.mxu0 %vm39_vm0, %v51_v6  ;;  %v152_v12 = vld [vmem:[#allocation3 + $0x8] sm:$0xff]  ;;  %v151_v14 = vld [vmem:[#allocation3] sm:$0xff]  ;;  %p447_p9 = pnand %p446_p8, %p440_p5 }
  0x17   :  { %407 = vmatmul.mubr.msk.f32.vlgmr.msra.gmra.mxu1 %vm39_vm0, %v46_v8  ;;  %391 = vmatprep.subr.msk.mxu0 %vm39_vm0, %v50_v9  ;;  %v48_v18 = vld [vmem:[#allocation2 + $0x8] sm:$0xff]  ;;  %v47_v20 = vld [vmem:[#allocation2] sm:$0xff] }
  0x18   :  { %409 = vmatprep.subr.msk.mxu1 %vm249_vm2, %v242_v11 }
  0x19   :  { %410 = vmatpush3.msk.msra.mxu1 %vm249_vm2, %v242_v11 }
  0x1a   :  { %392 = vmatpush3.xpose.msk.msra.mxu0 %vm39_vm0, %v50_v9 }
  0x1b   :  { %393 = vmatprep.subr.msk.mxu0 %vm39_vm0, %v49_v10 }
  0x1e   :  { %394 = vmatpush3.xpose.msk.msra.mxu0 %vm39_vm0, %v49_v10 }
  0x21   :  { %396 = vmatmul.mubr.msk.f32.vlgmr.msra.gmra.mxu0 %vm39_vm0, %v46_v8 }
  0xd7   :  { %v408_v13 = vpop.f32.mrf.mxu1 }
  0xd8   :  { %v233_v15 = vadd.f32 %v408_v13, %v152_v12 }
  0xd9   :  { %v223_v16 = vpop.f32.mrf.mxu1 }
  0xda   :  { %236 = vst.msk [vmem:[#allocation3 + $0x8] sm:$0xff] %vm42_vm1, %v233_v15  ;;  %v232_v17 = vadd.f32 %v223_v16, %v151_v14 }
  0xdc   :  { %235 = vst.msk [vmem:[#allocation3] sm:$0xff] %vm42_vm1, %v232_v17 }
  0xe1   :  { %v397_v19 = vpop.f32.mrf.mxu0  ;;  %v241_v24 = vld [vmem:[#allocation3 + $0x8] sm:$0xff] }
  0xe2   :  { %v148_v21 = vadd.f32 %v397_v19, %v48_v18 }
  0xe3   :  { %v240_v22 = vld [vmem:[#allocation3] sm:$0xff]  ;;  %v138_v23 = vpop.f32.mrf.mxu0 }
  0xe4   :  { %411 = vmatprep.mubr.msk.f32.mxu1 %vm42_vm1, %v240_v22  ;;  %150 = vst.msk [vmem:[#allocation2 + $0x8] sm:$0xff] %vm39_vm0, %v148_v21  ;;  %v147_v25 = vadd.f32 %v138_v23, %v47_v20 }
  0xe5   :  { %412 = vmatmul.mubr.msk.f32.vlgmr.msra.gmra.mxu1 %vm42_vm1, %v241_v24 }
  0xe6   :  { %149 = vst.msk [vmem:[#allocation2] sm:$0xff] %vm39_vm0, %v147_v25 }
  0xeb   :  { %v329_v26 = vld [vmem:[#allocation2 + $0x8] sm:$0xff] }
  0xed   :  { %v328_v31 = vld [vmem:[#allocation2] sm:$0xff] }
 0x1a5   :  { %v413_v27 = vpop.f32.mrf.mxu1 }
 0x1a6   :  { %v331_v29 = vadd.f32 %v413_v27, %v329_v26 }
 0x1a7   :  { %v319_v30 = vpop.f32.mrf.mxu1 }
 0x1a8   :  { %v340_v32 = vadd.f32 %v371_v28, %v331_v29  ;;  %v330_v33 = vadd.f32 %v328_v31, %v319_v30 }
 0x1aa   :  { %342 = vst.msk [vmem:[#allocation7 + $0x8] sm:$0xff] %vm39_vm0, %v340_v32  ;;  %v339_v34 = vadd.f32 %v371_v28, %v330_v33 }
 0x1ac   :  { %341 = vst.msk [vmem:[#allocation7] sm:$0xff] %vm39_vm0, %v339_v34 }
 0x1ad   :  { %450 = shalt.err (!%p447_p9)
}
 0x1ae   :  { %354 = dma.vmem_to_hbm [thread:$0]  %s349_s17, 256, %s569_s5, [#allocation6], %s464_s21, %s464_s21, %s465_s22  }
 0x1af   :  { %461 = dma.done.wait [#allocation6], 256  }
 0x1b0   :  { %462 = vsyncadd [#allocation6], 4294967040 }
 0x1b1   :  { %358 = vsyncpa [#allocation5], 1 }
 0x1b2   :  { %359 = vsyncpa [#allocation6], 1 }

</bundles_post_ra>
